<compile_context>
chip_gen: v7x
topology: tpu7x:2x2x1
jax: 0.10.0
libtpu: 0.0.40
codegen_flags: <defaults>
</compile_context>

<pallas_src>
import functools
import numpy as np

import jax
import jax.numpy as jnp
from jax.experimental import pallas as pl
from jax.experimental.pallas import tpu as pltpu


_MASK_VALUE = -1e30  # finite "-inf": every causal row has >= 1 unmasked column


def _layernorm(v, gamma, beta, eps=1e-5):
    # PyTorch nn.LayerNorm: biased variance, eps inside rsqrt.  Two-pass
    # centered statistics kept in f32.
    mu = jnp.mean(v, axis=-1, keepdims=True)
    c = v - mu
    var = jnp.mean(c * c, axis=-1, keepdims=True)
    return c * jax.lax.rsqrt(var + eps) * gamma + beta


# --------------------------------------------------------------------------
# Pass 1: LN1 + fused Q/K/V projections, computed exactly once per seq tile.
# --------------------------------------------------------------------------
def qkv_projection_kernel(x_ref, g1_ref, b1_ref, wq_ref, wk_ref, wv_ref,
                          q_ref, k_ref, v_ref, *, h, inv_sqrt_dk):
    nx = _layernorm(x_ref[0], g1_ref[...], b1_ref[...]).astype(jnp.bfloat16)
    # Static head loop (projection only runs B*nq times, and each iteration
    # stores immediately so live ranges stay bounded).
    for i in range(h):
        q_i = jnp.dot(nx, wq_ref[i], preferred_element_type=jnp.float32)
        # fold 1/sqrt(d_k) into Q once, here.
        q_ref[0, i] = (q_i * inv_sqrt_dk).astype(jnp.bfloat16)
        k_ref[0, i] = jnp.dot(
            nx, wk_ref[i], preferred_element_type=jnp.float32
        ).astype(jnp.bfloat16)
        v_ref[0, i] = jnp.dot(
            nx, wv_ref[i], preferred_element_type=jnp.float32
        ).astype(jnp.bfloat16)


# --------------------------------------------------------------------------
# Pass 2: causal flash attention (online softmax) + output proj + residual.
# --------------------------------------------------------------------------
def attention_kernel(x_ref, q_ref, k_ref, v_ref, wo_ref, o_ref,
                     m_scratch, l_scratch, acc_scratch, *, tq, tk):
    qi = pl.program_id(1)
    kv = pl.program_id(2)

    @pl.when(kv == 0)
    def _init():
        m_scratch[...] = jnp.full(m_scratch.shape, _MASK_VALUE, jnp.float32)
        l_scratch[...] = jnp.zeros(l_scratch.shape, jnp.float32)
        acc_scratch[...] = jnp.zeros(acc_scratch.shape, jnp.float32)

    def _scores():
        # (h, tq, d) x (h, tk, d) -> (h, tq, tk), contraction on the feature
        # dim (no materialized transpose), f32 accumulation.
        return jnp.einsum('hqd,hkd->hqk', q_ref[0], k_ref[0],
                          preferred_element_type=jnp.float32)

    def _online_softmax_update(s):
        m_prev = m_scratch[...]                                   # (h, tq, 1)
        m_new = jnp.maximum(m_prev, jnp.max(s, axis=-1, keepdims=True))
        alpha = jnp.exp(m_prev - m_new)
        p = jnp.exp(s - m_new)
        l_scratch[...] = alpha * l_scratch[...] + jnp.sum(p, axis=-1,
                                                          keepdims=True)
        acc_scratch[...] = alpha * acc_scratch[...] + jnp.einsum(
            'hqk,hkd->hqd', p.astype(jnp.bfloat16), v_ref[0],
            preferred_element_type=jnp.float32)
        m_scratch[...] = m_new

    # Off-diagonal tiles are fully inside the causal region: no mask math.
    @pl.when(kv < qi)
    def _off_diagonal():
        _online_softmax_update(_scores())

    # Diagonal tile: mask, update, then finalize.  Compute and finalize live
    # in the SAME pl.when block so their ordering is explicit.
    @pl.when(kv == qi)
    def _diagonal_and_finalize():
        row = jax.lax.broadcasted_iota(jnp.int32, (tq, tk), 0)
        col = jax.lax.broadcasted_iota(jnp.int32, (tq, tk), 1)
        causal = (col <= row)[None, :, :]       # local coords valid: tq == tk
        _online_softmax_update(jnp.where(causal, _scores(), _MASK_VALUE))

        inv_l = pl.reciprocal(l_scratch[...], approx=True)         # (h, tq, 1)
        heads = (acc_scratch[...] * inv_l).astype(jnp.bfloat16)    # (h, tq, dv)
        proj = jnp.einsum('hqv,hvd->hqd', heads, wo_ref[...],
                          preferred_element_type=jnp.float32)      # (h, tq, D)
        attn_out = jnp.sum(proj, axis=0)                           # (tq, D)
        o_ref[0] = (x_ref[0] + attn_out).astype(o_ref.dtype)       # dropout1=id


# --------------------------------------------------------------------------
# Pass 3: LN2 + feed-forward + residual (kept out of the attention kernel so
# its weights are never resident during the nq^2 attention steps).
# --------------------------------------------------------------------------
def ffn_kernel(x_ref, g2_ref, b2_ref, wff1_ref, bff1_ref, wff2_ref, bff2_ref,
               o_ref):
    x1 = x_ref[0]                                                  # (tq, D)
    nx2 = _layernorm(x1, g2_ref[...], b2_ref[...])
    hmid = jnp.dot(nx2.astype(jnp.bfloat16), wff1_ref[...],
                   preferred_element_type=jnp.float32) + bff1_ref[...]
    hmid = jnp.maximum(hmid, 0.0)                                  # ReLU
    ff = jnp.dot(hmid.astype(jnp.bfloat16), wff2_ref[...],
                 preferred_element_type=jnp.float32) + bff2_ref[...]
    o_ref[0] = (x1 + ff).astype(o_ref.dtype)                       # dropout2=id


# --------------------------------------------------------------------------
# Wrapper
# --------------------------------------------------------------------------
def _const_spec(a):
    n = a.ndim
    return pl.BlockSpec(a.shape, lambda *_: (0,) * n)


def _vmem_limit(estimate_bytes):
    # 2x headroom over the raw estimate, never below the common 32 MiB default
    # and never above the smallest physical VMEM (v7x: 64 MiB per TC).
    return int(min(max(2 * estimate_bytes, 32 * 1024 * 1024),
                   64 * 1024 * 1024))


def decoder_block(x, params, *, seq_tile=None):
    B, S, D = x.shape
    (wq, wk, wv, wo, g1, b1, g2, b2, wff1, bff1, wff2, bff2) = params
    h, _, d_Q = wq.shape
    d_K = wk.shape[2]
    d_V = wv.shape[2]
    d_mid = wff1.shape[1]

    if seq_tile is None:
        # 512-row tiles (v5e/v6e budget); clamp to S for short sequences.
        # TODO(synk): re-derive the tile budget for v7x's 64 MiB VMEM.
        seq_tile = min(S, 512)
    assert S % seq_tile == 0, "S must be divisible by the sequence tile"
    tq = tk = seq_tile
    nq = S // seq_tile

    # bf16 weights, head axis leading so per-head access is sublane-cheap.
    wq_b = wq.astype(jnp.bfloat16)                       # (h, D, d_Q)
    wk_b = wk.astype(jnp.bfloat16)                       # (h, D, d_K)
    wv_b = wv.astype(jnp.bfloat16)                       # (h, D, d_V)
    wo_r = wo.reshape(h, d_V, D).astype(jnp.bfloat16)    # (h, d_V, D)
    wff1_b = wff1.astype(jnp.bfloat16)
    wff2_b = wff2.astype(jnp.bfloat16)

    # ------------------ pass 1: LN1 + Q/K/V projections ---------------------
    proj_kernel = functools.partial(
        qkv_projection_kernel, h=h, inv_sqrt_dk=float(1.0 / np.sqrt(d_Q)))
    proj_bytes = (2 * tq * D * 4
                  + h * D * (d_Q + d_K + d_V) * 2 * 2
                  + 2 * h * tq * (d_Q + d_K + d_V) * 2
                  + 4 * D * 4)
    q_h, k_h, v_h = pl.pallas_call(
        proj_kernel,
        out_shape=(jax.ShapeDtypeStruct((B, h, S, d_Q), jnp.bfloat16),
                   jax.ShapeDtypeStruct((B, h, S, d_K), jnp.bfloat16),
                   jax.ShapeDtypeStruct((B, h, S, d_V), jnp.bfloat16)),
        grid_spec=pltpu.PrefetchScalarGridSpec(
            num_scalar_prefetch=0,
            grid=(B, nq),
            in_specs=[
                pl.BlockSpec((1, tq, D), lambda b, i: (b, i, 0)),
                _const_spec(g1), _const_spec(b1),
                _const_spec(wq_b), _const_spec(wk_b), _const_spec(wv_b),
            ],
            out_specs=[
                pl.BlockSpec((1, h, tq, d_Q), lambda b, i: (b, 0, i, 0)),
                pl.BlockSpec((1, h, tq, d_K), lambda b, i: (b, 0, i, 0)),
                pl.BlockSpec((1, h, tq, d_V), lambda b, i: (b, 0, i, 0)),
            ],
        ),
        compiler_params=pltpu.CompilerParams(
            dimension_semantics=("parallel", "parallel"),
            vmem_limit_bytes=_vmem_limit(proj_bytes)),
    )(x, g1, b1, wq_b, wk_b, wv_b)

    # ------------------ pass 2: causal flash attention ----------------------
    attn_kernel = functools.partial(attention_kernel, tq=tq, tk=tk)
    attn_bytes = (2 * tq * D * 4                    # x block (residual)
                  + 2 * h * tq * d_Q * 2            # Q block
                  + 2 * h * tk * d_K * 2            # K block
                  + 2 * h * tk * d_V * 2            # V block
                  + 2 * h * d_V * D * 2             # wo
                  + 2 * tq * D * 4                  # out block
                  + h * tq * (d_V + 2) * 4)         # scratch
    x1 = pl.pallas_call(
        attn_kernel,
        out_shape=jax.ShapeDtypeStruct((B, S, D), x.dtype),
        grid_spec=pltpu.PrefetchScalarGridSpec(
            num_scalar_prefetch=0,
            grid=(B, nq, nq),
            in_specs=[
                pl.BlockSpec((1, tq, D), lambda b, qi, kv: (b, qi, 0)),
                pl.BlockSpec((1, h, tq, d_Q),
                             lambda b, qi, kv: (b, 0, qi, 0)),
                # Clamp the kv block index so fully-masked steps (kv > qi)
                # reuse the resident tile instead of issuing a fresh DMA.
                pl.BlockSpec((1, h, tk, d_K),
                             lambda b, qi, kv: (b, 0, jnp.minimum(kv, qi), 0)),
                pl.BlockSpec((1, h, tk, d_V),
                             lambda b, qi, kv: (b, 0, jnp.minimum(kv, qi), 0)),
                _const_spec(wo_r),
            ],
            out_specs=pl.BlockSpec((1, tq, D), lambda b, qi, kv: (b, qi, 0)),
            scratch_shapes=[
                pltpu.VMEM((h, tq, 1), jnp.float32),     # running max
                pltpu.VMEM((h, tq, 1), jnp.float32),     # running sum
                pltpu.VMEM((h, tq, d_V), jnp.float32),   # accumulator
            ],
        ),
        compiler_params=pltpu.CompilerParams(
            dimension_semantics=("parallel", "parallel", "arbitrary"),
            vmem_limit_bytes=_vmem_limit(attn_bytes)),
    )(x, q_h, k_h, v_h, wo_r)

    # ------------------ pass 3: LN2 + FFN + residual ------------------------
    ffn_bytes = (2 * 2 * tq * D * 4
                 + 2 * D * d_mid * 2
                 + 2 * d_mid * D * 2
                 + (d_mid + 3 * D) * 4)
    out = pl.pallas_call(
        ffn_kernel,
        out_shape=jax.ShapeDtypeStruct((B, S, D), x.dtype),
        grid_spec=pltpu.PrefetchScalarGridSpec(
            num_scalar_prefetch=0,
            grid=(B, nq),
            in_specs=[
                pl.BlockSpec((1, tq, D), lambda b, i: (b, i, 0)),
                _const_spec(g2), _const_spec(b2),
                _const_spec(wff1_b), _const_spec(bff1),
                _const_spec(wff2_b), _const_spec(bff2),
            ],
            out_specs=pl.BlockSpec((1, tq, D), lambda b, i: (b, i, 0)),
        ),
        compiler_params=pltpu.CompilerParams(
            dimension_semantics=("parallel", "parallel"),
            vmem_limit_bytes=_vmem_limit(ffn_bytes)),
    )(x1, g2, b2, wff1_b, bff1, wff2_b, bff2)

    return out


def reference(x, params):
    """Pure-JAX f32 reference for sanity checking."""
    (wq, wk, wv, wo, g1, b1, g2, b2, wff1, bff1, wff2, bff2) = params
    S = x.shape[1]
    d_k = wq.shape[2]

    def ln(v, g, b):
        mu = v.mean(-1, keepdims=True)
        var = ((v - mu) ** 2).mean(-1, keepdims=True)
        return (v - mu) / jnp.sqrt(var + 1e-5) * g + b

    nx = ln(x, g1, b1)
    mask = jnp.tril(jnp.ones((S, S), bool))
    heads = []
    for i in range(wq.shape[0]):
        q = nx @ wq[i]; k = nx @ wk[i]; v = nx @ wv[i]
        sc = (q @ jnp.swapaxes(k, -2, -1)) / np.sqrt(d_k)
        sc = jnp.where(mask, sc, -jnp.inf)
        heads.append(jax.nn.softmax(sc, axis=-1) @ v)
    x1 = x + jnp.concatenate(heads, -1) @ wo
    nx2 = ln(x1, g2, b2)
    ff = jax.nn.relu(nx2 @ wff1 + bff1) @ wff2 + bff2
    return x1 + ff


if __name__ == "__main__":
    # Small deterministic configuration matching the module's forward.
    B, S = 2, 8
    d_model, d_middle = 32, 64
    h, d_Q, d_K, d_V = 2, 16, 16, 16

    key = jax.random.PRNGKey(0)
    keys = jax.random.split(key, 9)

    scale = 0.1
    wq = scale * jax.random.normal(keys[0], (h, d_model, d_Q), jnp.float32)
    wk = scale * jax.random.normal(keys[1], (h, d_model, d_K), jnp.float32)
    wv = scale * jax.random.normal(keys[2], (h, d_model, d_V), jnp.float32)
    wo = scale * jax.random.normal(keys[3], (h * d_V, d_model), jnp.float32)
    g1 = jnp.ones((1, d_model), jnp.float32)
    b1 = jnp.zeros((1, d_model), jnp.float32)
    g2 = jnp.ones((1, d_model), jnp.float32)
    b2 = jnp.zeros((1, d_model), jnp.float32)
    wff1 = scale * jax.random.normal(keys[4], (d_model, d_middle), jnp.float32)
    bff1 = scale * jax.random.normal(keys[5], (1, d_middle), jnp.float32)
    wff2 = scale * jax.random.normal(keys[6], (d_middle, d_model), jnp.float32)
    bff2 = scale * jax.random.normal(keys[7], (1, d_model), jnp.float32)
    params = (wq, wk, wv, wo, g1, b1, g2, b2, wff1, bff1, wff2, bff2)

    x = jax.random.normal(keys[8], (B, S, d_model), jnp.float32)

    out = jax.block_until_ready(decoder_block(x, params))
    ref = jax.block_until_ready(reference(x, params))

    assert out.shape == (B, S, d_model)
    # bf16 matmul inputs (f32 accumulation) + approx reciprocal -> looser tol.
    assert np.allclose(np.asarray(out), np.asarray(ref), atol=3e-2, rtol=3e-2), (
        float(np.max(np.abs(np.asarray(out) - np.asarray(ref)))))

    print("KERNEL_OK")
</pallas_src>

<mosaic_0001>
module attributes {stable_mosaic.version = 11 : i64} {
  func.func @qkv_projection_kernel(%arg0: i32, %arg1: i32, %arg2: memref<1x8x32xf32, #tpu.memory_space<vmem>>, %arg3: memref<1x32xf32, #tpu.memory_space<vmem>>, %arg4: memref<1x32xf32, #tpu.memory_space<vmem>>, %arg5: memref<2x32x16xbf16, #tpu.memory_space<vmem>>, %arg6: memref<2x32x16xbf16, #tpu.memory_space<vmem>>, %arg7: memref<2x32x16xbf16, #tpu.memory_space<vmem>>, %arg8: memref<1x2x8x16xbf16, #tpu.memory_space<vmem>>, %arg9: memref<1x2x8x16xbf16, #tpu.memory_space<vmem>>, %arg10: memref<1x2x8x16xbf16, #tpu.memory_space<vmem>>) attributes {dimension_semantics = [#tpu.dimension_semantics<parallel>, #tpu.dimension_semantics<parallel>], iteration_bounds = array<i64: 2, 1>, scalar_prefetch = 0 : i64, scratch_operands = 0 : i64, tpu.core_type = #tpu.core_type<tc>, window_params = [{transform_indices = @transform_0, window_bounds = array<i64: 1, 8, 32>}, {pipeline_mode = #tpu.pipeline_mode<synchronous>, transform_indices = @transform_1, window_bounds = array<i64: 1, 32>}, {pipeline_mode = #tpu.pipeline_mode<synchronous>, transform_indices = @transform_2, window_bounds = array<i64: 1, 32>}, {pipeline_mode = #tpu.pipeline_mode<synchronous>, transform_indices = @transform_3, window_bounds = array<i64: 2, 32, 16>}, {pipeline_mode = #tpu.pipeline_mode<synchronous>, transform_indices = @transform_4, window_bounds = array<i64: 2, 32, 16>}, {pipeline_mode = #tpu.pipeline_mode<synchronous>, transform_indices = @transform_5, window_bounds = array<i64: 2, 32, 16>}, {transform_indices = @transform_6, window_bounds = array<i64: 1, 2, 8, 16>}, {transform_indices = @transform_7, window_bounds = array<i64: 1, 2, 8, 16>}, {transform_indices = @transform_8, window_bounds = array<i64: 1, 2, 8, 16>}]} {
    %c0 = arith.constant 0 : index
    %c0_0 = arith.constant 0 : index
    %c0_1 = arith.constant 0 : index
    %0 = vector.load %arg2[%c0, %c0_0, %c0_1] : memref<1x8x32xf32, #tpu.memory_space<vmem>>, vector<1x8x32xf32>
    %1 = vector.shape_cast %0 : vector<1x8x32xf32> to vector<8x32xf32>
    %c0_2 = arith.constant 0 : index
    %c0_3 = arith.constant 0 : index
    %2 = vector.load %arg3[%c0_2, %c0_3] : memref<1x32xf32, #tpu.memory_space<vmem>>, vector<1x32xf32>
    %c0_4 = arith.constant 0 : index
    %c0_5 = arith.constant 0 : index
    %3 = vector.load %arg4[%c0_4, %c0_5] : memref<1x32xf32, #tpu.memory_space<vmem>>, vector<1x32xf32>
    %cst = arith.constant dense<0.000000e+00> : vector<8xf32>
    %4 = vector.multi_reduction <add>, %1, %cst [1] : vector<8x32xf32> to vector<8xf32>
    %5 = vector.shape_cast %4 : vector<8xf32> to vector<8x1xf32>
    %cst_6 = arith.constant 3.200000e+01 : f32
    %6 = vector.broadcast %cst_6 : f32 to vector<8x1xf32>
    %7 = arith.divf %5, %6 : vector<8x1xf32>
    %8 = vector.broadcast %7 : vector<8x1xf32> to vector<8x32xf32>
    %9 = arith.subf %1, %8 : vector<8x32xf32>
    %10 = arith.mulf %9, %9 : vector<8x32xf32>
    %cst_7 = arith.constant dense<0.000000e+00> : vector<8xf32>
    %11 = vector.multi_reduction <add>, %10, %cst_7 [1] : vector<8x32xf32> to vector<8xf32>
    %12 = vector.shape_cast %11 : vector<8xf32> to vector<8x1xf32>
    %cst_8 = arith.constant 3.200000e+01 : f32
    %13 = vector.broadcast %cst_8 : f32 to vector<8x1xf32>
    %14 = arith.divf %12, %13 : vector<8x1xf32>
    %cst_9 = arith.constant 9.99999974E-6 : f32
    %15 = vector.broadcast %cst_9 : f32 to vector<8x1xf32>
    %16 = arith.addf %14, %15 : vector<8x1xf32>
    %17 = math.rsqrt %16 : vector<8x1xf32>
    %18 = vector.broadcast %17 : vector<8x1xf32> to vector<8x32xf32>
    %19 = arith.mulf %9, %18 : vector<8x32xf32>
    %20 = vector.broadcast %2 : vector<1x32xf32> to vector<8x32xf32>
    %21 = arith.mulf %19, %20 : vector<8x32xf32>
    %22 = vector.broadcast %3 : vector<1x32xf32> to vector<8x32xf32>
    %23 = arith.addf %21, %22 : vector<8x32xf32>
    %24 = arith.truncf %23 : vector<8x32xf32> to vector<8x32xbf16>
    %c0_10 = arith.constant 0 : index
    %c0_11 = arith.constant 0 : index
    %c0_12 = arith.constant 0 : index
    %25 = vector.load %arg5[%c0_10, %c0_11, %c0_12] : memref<2x32x16xbf16, #tpu.memory_space<vmem>>, vector<1x32x16xbf16>
    %26 = vector.shape_cast %25 : vector<1x32x16xbf16> to vector<32x16xbf16>
    %cst_13 = arith.constant dense<0.000000e+00> : vector<8x16xf32>
    %27 = tpu.matmul %24, %26, %cst_13 {dimension_numbers = #tpu.dot_dimension_numbers<[1], [0], [0], [1], [0, 0, 1, 1], [], []>} : vector<8x32xbf16>, vector<32x16xbf16>, vector<8x16xf32> -> vector<8x16xf32>
    %cst_14 = arith.constant 2.500000e-01 : f32
    %28 = vector.broadcast %cst_14 : f32 to vector<8x16xf32>
    %29 = arith.mulf %27, %28 : vector<8x16xf32>
    %30 = arith.truncf %29 : vector<8x16xf32> to vector<8x16xbf16>
    %c0_15 = arith.constant 0 : index
    %c0_16 = arith.constant 0 : index
    %c0_17 = arith.constant 0 : index
    %c0_18 = arith.constant 0 : index
    %31 = vector.load %arg8[%c0_15, %c0_16, %c0_17, %c0_18] : memref<1x2x8x16xbf16, #tpu.memory_space<vmem>>, vector<1x1x8x16xbf16>
    %32 = vector.shape_cast %31 : vector<1x1x8x16xbf16> to vector<8x16xbf16>
    %33 = vector.shape_cast %30 : vector<8x16xbf16> to vector<1x1x8x16xbf16>
    tpu.vector_store %arg8[%c0_15, %c0_16, %c0_17, %c0_18], %33 {strides = array<i32>} : memref<1x2x8x16xbf16, #tpu.memory_space<vmem>>, vector<1x1x8x16xbf16>,
    %c0_19 = arith.constant 0 : index
    %c0_20 = arith.constant 0 : index
    %c0_21 = arith.constant 0 : index
    %34 = vector.load %arg6[%c0_19, %c0_20, %c0_21] : memref<2x32x16xbf16, #tpu.memory_space<vmem>>, vector<1x32x16xbf16>
    %35 = vector.shape_cast %34 : vector<1x32x16xbf16> to vector<32x16xbf16>
    %cst_22 = arith.constant dense<0.000000e+00> : vector<8x16xf32>
    %36 = tpu.matmul %24, %35, %cst_22 {dimension_numbers = #tpu.dot_dimension_numbers<[1], [0], [0], [1], [0, 0, 1, 1], [], []>} : vector<8x32xbf16>, vector<32x16xbf16>, vector<8x16xf32> -> vector<8x16xf32>
    %37 = arith.truncf %36 : vector<8x16xf32> to vector<8x16xbf16>
    %c0_23 = arith.constant 0 : index
    %c0_24 = arith.constant 0 : index
    %c0_25 = arith.constant 0 : index
    %c0_26 = arith.constant 0 : index
    %38 = vector.load %arg9[%c0_23, %c0_24, %c0_25, %c0_26] : memref<1x2x8x16xbf16, #tpu.memory_space<vmem>>, vector<1x1x8x16xbf16>
    %39 = vector.shape_cast %38 : vector<1x1x8x16xbf16> to vector<8x16xbf16>
    %40 = vector.shape_cast %37 : vector<8x16xbf16> to vector<1x1x8x16xbf16>
    tpu.vector_store %arg9[%c0_23, %c0_24, %c0_25, %c0_26], %40 {strides = array<i32>} : memref<1x2x8x16xbf16, #tpu.memory_space<vmem>>, vector<1x1x8x16xbf16>,
    %c0_27 = arith.constant 0 : index
    %c0_28 = arith.constant 0 : index
    %c0_29 = arith.constant 0 : index
    %41 = vector.load %arg7[%c0_27, %c0_28, %c0_29] : memref<2x32x16xbf16, #tpu.memory_space<vmem>>, vector<1x32x16xbf16>
    %42 = vector.shape_cast %41 : vector<1x32x16xbf16> to vector<32x16xbf16>
    %cst_30 = arith.constant dense<0.000000e+00> : vector<8x16xf32>
    %43 = tpu.matmul %24, %42, %cst_30 {dimension_numbers = #tpu.dot_dimension_numbers<[1], [0], [0], [1], [0, 0, 1, 1], [], []>} : vector<8x32xbf16>, vector<32x16xbf16>, vector<8x16xf32> -> vector<8x16xf32>
    %44 = arith.truncf %43 : vector<8x16xf32> to vector<8x16xbf16>
    %c0_31 = arith.constant 0 : index
    %c0_32 = arith.constant 0 : index
    %c0_33 = arith.constant 0 : index
    %c0_34 = arith.constant 0 : index
    %45 = vector.load %arg10[%c0_31, %c0_32, %c0_33, %c0_34] : memref<1x2x8x16xbf16, #tpu.memory_space<vmem>>, vector<1x1x8x16xbf16>
    %46 = vector.shape_cast %45 : vector<1x1x8x16xbf16> to vector<8x16xbf16>
    %47 = vector.shape_cast %44 : vector<8x16xbf16> to vector<1x1x8x16xbf16>
    tpu.vector_store %arg10[%c0_31, %c0_32, %c0_33, %c0_34], %47 {strides = array<i32>} : memref<1x2x8x16xbf16, #tpu.memory_space<vmem>>, vector<1x1x8x16xbf16>,
    %c1 = arith.constant 1 : index
    %c0_35 = arith.constant 0 : index
    %c0_36 = arith.constant 0 : index
    %48 = vector.load %arg5[%c1, %c0_35, %c0_36] : memref<2x32x16xbf16, #tpu.memory_space<vmem>>, vector<1x32x16xbf16>
    %49 = vector.shape_cast %48 : vector<1x32x16xbf16> to vector<32x16xbf16>
    %cst_37 = arith.constant dense<0.000000e+00> : vector<8x16xf32>
    %50 = tpu.matmul %24, %49, %cst_37 {dimension_numbers = #tpu.dot_dimension_numbers<[1], [0], [0], [1], [0, 0, 1, 1], [], []>} : vector<8x32xbf16>, vector<32x16xbf16>, vector<8x16xf32> -> vector<8x16xf32>
    %cst_38 = arith.constant 2.500000e-01 : f32
    %51 = vector.broadcast %cst_38 : f32 to vector<8x16xf32>
    %52 = arith.mulf %50, %51 : vector<8x16xf32>
    %53 = arith.truncf %52 : vector<8x16xf32> to vector<8x16xbf16>
    %c0_39 = arith.constant 0 : index
    %c1_40 = arith.constant 1 : index
    %c0_41 = arith.constant 0 : index
    %c0_42 = arith.constant 0 : index
    %54 = vector.load %arg8[%c0_39, %c1_40, %c0_41, %c0_42] : memref<1x2x8x16xbf16, #tpu.memory_space<vmem>>, vector<1x1x8x16xbf16>
    %55 = vector.shape_cast %54 : vector<1x1x8x16xbf16> to vector<8x16xbf16>
    %56 = vector.shape_cast %53 : vector<8x16xbf16> to vector<1x1x8x16xbf16>
    tpu.vector_store %arg8[%c0_39, %c1_40, %c0_41, %c0_42], %56 {strides = array<i32>} : memref<1x2x8x16xbf16, #tpu.memory_space<vmem>>, vector<1x1x8x16xbf16>,
    %c1_43 = arith.constant 1 : index
    %c0_44 = arith.constant 0 : index
    %c0_45 = arith.constant 0 : index
    %57 = vector.load %arg6[%c1_43, %c0_44, %c0_45] : memref<2x32x16xbf16, #tpu.memory_space<vmem>>, vector<1x32x16xbf16>
    %58 = vector.shape_cast %57 : vector<1x32x16xbf16> to vector<32x16xbf16>
    %cst_46 = arith.constant dense<0.000000e+00> : vector<8x16xf32>
    %59 = tpu.matmul %24, %58, %cst_46 {dimension_numbers = #tpu.dot_dimension_numbers<[1], [0], [0], [1], [0, 0, 1, 1], [], []>} : vector<8x32xbf16>, vector<32x16xbf16>, vector<8x16xf32> -> vector<8x16xf32>
    %60 = arith.truncf %59 : vector<8x16xf32> to vector<8x16xbf16>
    %c0_47 = arith.constant 0 : index
    %c1_48 = arith.constant 1 : index
    %c0_49 = arith.constant 0 : index
    %c0_50 = arith.constant 0 : index
    %61 = vector.load %arg9[%c0_47, %c1_48, %c0_49, %c0_50] : memref<1x2x8x16xbf16, #tpu.memory_space<vmem>>, vector<1x1x8x16xbf16>
    %62 = vector.shape_cast %61 : vector<1x1x8x16xbf16> to vector<8x16xbf16>
    %63 = vector.shape_cast %60 : vector<8x16xbf16> to vector<1x1x8x16xbf16>
    tpu.vector_store %arg9[%c0_47, %c1_48, %c0_49, %c0_50], %63 {strides = array<i32>} : memref<1x2x8x16xbf16, #tpu.memory_space<vmem>>, vector<1x1x8x16xbf16>,
    %c1_51 = arith.constant 1 : index
    %c0_52 = arith.constant 0 : index
    %c0_53 = arith.constant 0 : index
    %64 = vector.load %arg7[%c1_51, %c0_52, %c0_53] : memref<2x32x16xbf16, #tpu.memory_space<vmem>>, vector<1x32x16xbf16>
    %65 = vector.shape_cast %64 : vector<1x32x16xbf16> to vector<32x16xbf16>
    %cst_54 = arith.constant dense<0.000000e+00> : vector<8x16xf32>
    %66 = tpu.matmul %24, %65, %cst_54 {dimension_numbers = #tpu.dot_dimension_numbers<[1], [0], [0], [1], [0, 0, 1, 1], [], []>} : vector<8x32xbf16>, vector<32x16xbf16>, vector<8x16xf32> -> vector<8x16xf32>
    %67 = arith.truncf %66 : vector<8x16xf32> to vector<8x16xbf16>
    %c0_55 = arith.constant 0 : index
    %c1_56 = arith.constant 1 : index
    %c0_57 = arith.constant 0 : index
    %c0_58 = arith.constant 0 : index
    %68 = vector.load %arg10[%c0_55, %c1_56, %c0_57, %c0_58] : memref<1x2x8x16xbf16, #tpu.memory_space<vmem>>, vector<1x1x8x16xbf16>
    %69 = vector.shape_cast %68 : vector<1x1x8x16xbf16> to vector<8x16xbf16>
    %70 = vector.shape_cast %67 : vector<8x16xbf16> to vector<1x1x8x16xbf16>
    tpu.vector_store %arg10[%c0_55, %c1_56, %c0_57, %c0_58], %70 {strides = array<i32>} : memref<1x2x8x16xbf16, #tpu.memory_space<vmem>>, vector<1x1x8x16xbf16>,
    return
  }
  func.func @transform_0(%arg0: i32, %arg1: i32) -> (i32, i32, i32) {
    %c0_i32 = arith.constant 0 : i32
    %c0_i32_0 = arith.constant 0 : i32
    return %arg0, %arg1, %c0_i32 : i32, i32, i32
  }
  func.func @transform_1(%arg0: i32, %arg1: i32) -> (i32, i32) {
    %c0_i32 = arith.constant 0 : i32
    %c0_i32_0 = arith.constant 0 : i32
    %c0_i32_1 = arith.constant 0 : i32
    return %c0_i32, %c0_i32_0 : i32, i32
  }
  func.func @transform_2(%arg0: i32, %arg1: i32) -> (i32, i32) {
    %c0_i32 = arith.constant 0 : i32
    %c0_i32_0 = arith.constant 0 : i32
    %c0_i32_1 = arith.constant 0 : i32
    return %c0_i32, %c0_i32_0 : i32, i32
  }
  func.func @transform_3(%arg0: i32, %arg1: i32) -> (i32, i32, i32) {
    %c0_i32 = arith.constant 0 : i32
    %c0_i32_0 = arith.constant 0 : i32
    %c0_i32_1 = arith.constant 0 : i32
    %c0_i32_2 = arith.constant 0 : i32
    return %c0_i32, %c0_i32_0, %c0_i32_1 : i32, i32, i32
  }
  func.func @transform_4(%arg0: i32, %arg1: i32) -> (i32, i32, i32) {
    %c0_i32 = arith.constant 0 : i32
    %c0_i32_0 = arith.constant 0 : i32
    %c0_i32_1 = arith.constant 0 : i32
    %c0_i32_2 = arith.constant 0 : i32
    return %c0_i32, %c0_i32_0, %c0_i32_1 : i32, i32, i32
  }
  func.func @transform_5(%arg0: i32, %arg1: i32) -> (i32, i32, i32) {
    %c0_i32 = arith.constant 0 : i32
    %c0_i32_0 = arith.constant 0 : i32
    %c0_i32_1 = arith.constant 0 : i32
    %c0_i32_2 = arith.constant 0 : i32
    return %c0_i32, %c0_i32_0, %c0_i32_1 : i32, i32, i32
  }
  func.func @transform_6(%arg0: i32, %arg1: i32) -> (i32, i32, i32, i32) {
    %c0_i32 = arith.constant 0 : i32
    %c0_i32_0 = arith.constant 0 : i32
    %c0_i32_1 = arith.constant 0 : i32
    return %arg0, %c0_i32, %arg1, %c0_i32_0 : i32, i32, i32, i32
  }
  func.func @transform_7(%arg0: i32, %arg1: i32) -> (i32, i32, i32, i32) {
    %c0_i32 = arith.constant 0 : i32
    %c0_i32_0 = arith.constant 0 : i32
    %c0_i32_1 = arith.constant 0 : i32
    return %arg0, %c0_i32, %arg1, %c0_i32_0 : i32, i32, i32, i32
  }
  func.func @transform_8(%arg0: i32, %arg1: i32) -> (i32, i32, i32, i32) {
    %c0_i32 = arith.constant 0 : i32
    %c0_i32_0 = arith.constant 0 : i32
    %c0_i32_1 = arith.constant 0 : i32
    return %arg0, %c0_i32, %arg1, %c0_i32_0 : i32, i32, i32, i32
  }
}

</mosaic_0001>

<bundles_post_ra>
// kernel: tpu_custom_call.1
= control target key start
LH: loop header
LB: loop body
LE: loop exit
PB: predicated region body
PF: predicated region fallthrough
CT: control target
= control target key end

     0   :  { %s1618_s0 = inlined_call_operand.vmem [shape: f32[2,8,32], index: 0, kind: input, shape index: {}]   ;;  %s1619_s1 = inlined_call_operand.vmem [shape: f32[1,32], index: 1, kind: input, shape index: {}]   ;;  %s1620_s2 = inlined_call_operand.vmem [shape: f32[1,32], index: 2, kind: input, shape index: {}]   ;;  %s1621_s3 = inlined_call_operand.vmem [shape: bf16[2,32,16], index: 3, kind: input, shape index: {}]   ;;  %s1622_s4 = inlined_call_operand.vmem [shape: bf16[2,32,16], index: 4, kind: input, shape index: {}]   ;;  %s1623_s5 = inlined_call_operand.vmem [shape: bf16[2,32,16], index: 5, kind: input, shape index: {}]   ;;  %s1624_s6 = inlined_call_operand.hbm [shape: bf16[2,2,8,16], index: 6, kind: output, shape index: {0}]   ;;  %s1625_s7 = inlined_call_operand.hbm [shape: bf16[2,2,8,16], index: 7, kind: output, shape index: {1}]   ;;  %s1626_s8 = inlined_call_operand.hbm [shape: bf16[2,2,8,16], index: 8, kind: output, shape index: {2}]  }
   0x1   :  { %1630 = sst [smem:[#allocation9_spill]] %s1618_s0 }
   0x2   :  { %1631 = sst [smem:[#allocation10_spill]] %s1619_s1 }
   0x3   :  { %1632 = sst [smem:[#allocation11_spill]] %s1620_s2 }
   0x4   :  { %14 = vsyncpa [#allocation3], 0 }
   0x5   :  { %16 = vsyncpa [#allocation3 + $0x1], 0 }
   0x6   :  { %17 = vsyncpa [#allocation5], 0 }
   0x7   :  { %19 = vsyncpa [#allocation5 + $0x1], 0  ;;  %s1340_s27 = smov 0   ;;  %s1342_s28 = smov 0  }
   0x8   :  { %s1344_s29 = smov 0   ;;  %s1346_s30 = smov 0  }
   0x9   :  { %s1348_s9 = smov 0   ;;  %s1350_s10 = smov 0  }
   0xa LB: > { %s941_s11 = sadd.s32 4294967295, %s1286_s10   ;;  %s1627_s12 = sadd.s32 4294967294, %s1286_s10   ;;  %s1286_s10 = sphi %s1350_s10, %s25_s10   ;;  %s1282_s9 = sphi %s1348_s9, %s1644_s9   ;;  %s1278_s30 = sphi %s1346_s30, %s1643_s30   ;;  %s1274_s29 = sphi %s1344_s29, %s1642_s29   ;;  %s1270_s28 = sphi %s1342_s28, %s1641_s28   ;;  %s1266_s27 = sphi %s1340_s27, %s1640_s27  }
   0xb   : > { %s37_s13 = sadd.s32 1, %s1282_s9  ;;  %s179_s14 = sadd.s32 1, %s1274_s29 }
   0xc   : > { %p39_p0 = scmp.ge.s32.totalorder %s37_s13, 2  ;;  %p189_p1 = scmp.ne.s32.totalorder %s1274_s29, %s1270_s28 }
   0xd   : > { %p190_p2 = scmp.eq.s32.totalorder %s941_s11, 1  ;;  %p195_p3 = scmp.ne.s32.totalorder %s1270_s28, %s1266_s27 }
   0xe   : > { %s1646_s13 = smov (%p39_p0, %s37_s13), 0  ;;  %p196_p5 = scmp.eq.s32.totalorder %s1627_s12, 1 }
   0xf   : > { %p1382_p4 = por %p190_p2, %p189_p1  ;;  %s174_s16 = ssub.s32 %s1282_s9, %s1646_s13 }
  0x10   : > { %p945_p6 = scmp.ge.s32.totalorder %s1286_s10, 1  ;;  %p177_p7 = scmp.eq.s32.totalorder %s174_s16, 0 }
  0x11   : > { %p1391_p8 = por %p196_p5, %p195_p3  ;;  %p295_p9 = scmp.lt.s32.totalorder %s1286_s10, 3 }
  0x12   : > { %s1397_s18 = scalar_select %p177_p7, %s1274_s29, %s179_s14  }
  0x13   : > { %p296_p10 = pnand %p945_p6, %p295_p9 }
  0x14   : > { %p341_p11 = scmp.lt.s32.totalorder (!%p296_p10), %s1278_s30, 1  ;;  %vm352_vm0 = vcmask (!%p296_p10), 261120   ;;  %s1635_s0 = sld [smem:[#allocation9_spill]] (!%p296_p10)  ;;  %v1134_v7 = vld [vmem:[%s1621_s3] sm:$0xff] (!%p296_p10)   ;;  %v1288_v9 = vmov (!%p296_p10), 0.0   ;;  %v1136_v10 = vld [vmem:[%s1621_s3 + $0x8] sm:$0xff] (!%p296_p10)  }
  0x15   : > { %299 = sbr.rel (%p296_p10) target bundleno = 635 (0x27b), region = 44  ;;  %v1135_v8 = vld [vmem:[%s1622_s4] sm:$0xff] (!%p296_p10)   ;;  %1017 = vmatprep.subr.bf16.mxu0 (!%p296_p10), %v1288_v9  ;;  %1025 = vmatprep.subr.bf16.mxu1 (!%p296_p10), %v1288_v9  ;;  %v1137_v11 = vld [vmem:[%s1622_s4 + $0x8] sm:$0xff] (!%p296_p10)   ;;  %vm1289_vm1 = vmmov (!%p296_p10), 0   ;;  %s1636_s1 = sld [smem:[#allocation10_spill]] (!%p296_p10)  ;;  %v1139_v22 = vld [vmem:[%s1621_s3 + $0x10] sm:$0xff] (!%p296_p10)  }
  0x16   : > { %1018 = vmatpush3.bf16.msra.mxu0 (!%p296_p10), %v1134_v7  ;;  %1026 = vmatpush3.bf16.msra.mxu1 (!%p296_p10), %v1135_v8  ;;  %s1637_s2 = sld [smem:[#allocation11_spill]] (!%p296_p10)  ;;  %v1138_v21 = vld [vmem:[%s1623_s5] sm:$0xff] (!%p296_p10)   ;;  %v1140_v24 = vld [vmem:[%s1623_s5 + $0x8] sm:$0xff] (!%p296_p10)   ;;  %v1141_v25 = vld [vmem:[%s1621_s3 + $0x18] sm:$0xff] (!%p296_p10)   ;;  %s324_s22 = sand.u32 (!%p296_p10), 1, %s1270_s28   ;;  %vm443_vm2 = vcmask (!%p296_p10), 125952  }
  0x17   : > { %1019 = vmatprep.subr.bf16.mxu0 (!%p296_p10), %v1288_v9  ;;  %1027 = vmatprep.subr.bf16.mxu1 (!%p296_p10), %v1288_v9  ;;  %v1142_v26 = vld [vmem:[%s1622_s4 + $0x10] sm:$0xff] (!%p296_p10)   ;;  %v1144_v28 = vld [vmem:[%s1622_s4 + $0x18] sm:$0xff] (!%p296_p10)   ;;  %s1469_s14 = sshll.u32 (!%p296_p10), %s1278_s30, 7  ;;  %s1487_s12 = sand.u32 (!%p296_p10), 1, %s941_s11  }
  0x18   : > { %1021 = vmatprep.mubr.msk.bf16.mxu0 (!%p296_p10), %vm1289_vm1, %v1288_v9  ;;  %1029 = vmatprep.mubr.msk.bf16.mxu1 (!%p296_p10), %vm1289_vm1, %v1288_v9  ;;  %v1143_v27 = vld [vmem:[%s1623_s5 + $0x10] sm:$0xff] (!%p296_p10)   ;;  %v1145_v29 = vld [vmem:[%s1623_s5 + $0x18] sm:$0xff] (!%p296_p10)  }
  0x1a   : > { %1020 = vmatpush3.bf16.msra.mxu0 (!%p296_p10), %v1136_v10  ;;  %1028 = vmatpush3.bf16.msra.mxu1 (!%p296_p10), %v1137_v11 }
  0x1b   : > { %1033 = vmatprep.subr.bf16.mxu0 (!%p296_p10), %v1288_v9  ;;  %1041 = vmatprep.subr.bf16.mxu1 (!%p296_p10), %v1288_v9  ;;  %v950_v16 = vld [vmem:[%s1636_s1] ss:$0 sm:$0xff] (!%p296_p10)  ;;  %s1290_s1 = smov (!%p296_p10), [#allocation2]  }
  0x1c   : > { %s342_s19 = scalar_select %p341_p11, %s1278_s30, 1  ;;  %v951_v18 = vld [vmem:[%s1637_s2] ss:$0 sm:$0xff] }
  0x1d   : > { %s1152_s2 = sshll.u32 %s1290_s1, 4  ;;  %s1153_s2 = int_to_ptr.vmem [resolvable:$false] %s1152_s2 }
  0x1e   : > { %s949_s20 = sshll.u32 %s342_s19, 3  ;;  %s1154_s30 = scalar_lea.vmem %s1153_s2, 256 }
  0x1f   : > { %s347_s23 = scalar_lea.vmem %s1635_s0, %s949_s20  ;;  %s1481_s20 = scalar_lea.hbm %s1624_s6, %s1469_s14 }
  0x20   : > { %v349_v0 = vld [vmem:[%s347_s23] sm:$0xff]  ;;  %s946_s23 = sshll.u32 %s324_s22, 3 }
  0x21   : > { %v353_v1 = vsel %vm352_vm0, %v349_v0, 0.0  ;;  %s1463_s24 = scalar_lea.vmem [#allocation4], %s946_s23  ;;  %s326_s25 = scalar_lea.vmem [#allocation2], %s946_s23 }
  0x22   : > { %354 = vadd.xlane.f32.xlu0 %v353_v1  ;;  %s767_s26 = sshll.u32 %s326_s25, 4  ;;  %s1473_s16 = scalar_lea.vmem [#allocation6], %s946_s23  ;;  %s1471_s26 = int_to_ptr.vmem [resolvable:$true] %s767_s26 }
  0x23   : > { %s784_s21 = sshll.u32 %s1463_s24, 4  ;;  %s1491_s23 = scalar_lea.sflag [#allocation3], %s324_s22  ;;  %s1521_s21 = int_to_ptr.vmem [resolvable:$true] %s784_s21 }
  0x24   : > { %s1148_s0 = scalar_lea.vmem %s1471_s26, 128  ;;  %p1155_p1 = scmp.lt.s32.totalorder %s1471_s26, %s1153_s2 }
  0x25   : > { %p1149_p12 = scmp.ne.s32.totalorder %s1471_s26, %s1148_s0  ;;  %p1156_p2 = scmp.lt.s32.totalorder %s1154_s30, %s1148_s0 }
  0x27   : > { %p1150_p13 = pnand %p1149_p12, %p1382_p4  ;;  %p1157_p3 = por %p1156_p2, %p1155_p1 }
  0x29   : > { %p1151_p0 = pneg %p1150_p13 }
  0x2b   : > { %p1158_p5 = pnand %p1157_p3, %p1151_p0 }
  0xaf   : > { %v355_v2 = vpop.xlane.xlu0 %354 }
  0xb0   : > { %v357_v3 = vmul.f32 0.03125, %v355_v2 }
  0xb2   : > { %v358_v4 = vsub.f32 %v349_v0, %v357_v3 }
  0xb4   : > { %v359_v5 = vmul.f32 %v358_v4, %v358_v4 }
  0xb6   : > { %v360_v6 = vsel %vm352_vm0, %v359_v5, 0.0 }
  0xb7   : > { %361 = vadd.xlane.f32.xlu0 %v360_v6 }
 0x144   : > { %v362_v12 = vpop.xlane.xlu0 %361 }
 0x145   : > { %v363_v13 = vmul.f32 0.03125, %v362_v12 }
 0x147   : > { %v364_v14 = vadd.f32 1e-05, %v363_v13 }
 0x149   : > { %1146 = vrsqrt.f32 %v364_v14 }
 0x153   : > { %v1147_v15 = vpop.eup %1146 }
 0x154   : > { %v366_v17 = vmul.f32 %v1147_v15, %v358_v4 }
 0x156   : > { %v373_v19 = vmul.f32 %v950_v16, %v366_v17 }
 0x158   : > { %v380_v20 = vadd.f32 %v951_v18, %v373_v19 }
 0x15a   : > { %v381_v23 = vpack.c.bf16 %v380_v20, %v380_v20 }
 0x15c   : > { %1022 = vmatmul.mubr.msk.bf16.vlgmr.msra.gmra.mrb[0].mxu0 %vm352_vm0, %v381_v23  ;;  %1030 = vmatmul.mubr.msk.bf16.vlgmr.msra.gmra.mrb[0].mxu1 %vm352_vm0, %v381_v23 }
 0x15d   : > { %1034 = vmatpush3.bf16.msra.mxu0 %v1138_v21  ;;  %1042 = vmatpush3.bf16.msra.mxu1 %v1139_v22 }
 0x15e   : > { %1035 = vmatprep.subr.bf16.mxu0 %v1288_v9  ;;  %1043 = vmatprep.subr.bf16.mxu1 %v1288_v9 }
 0x15f   : > { %1037 = vmatprep.mubr.msk.bf16.mxu0 %vm1289_vm1, %v1288_v9  ;;  %1045 = vmatprep.mubr.msk.bf16.mxu1 %vm1289_vm1, %v1288_v9 }
 0x161   : > { %1036 = vmatpush3.bf16.msra.mxu0 %v1140_v24  ;;  %1044 = vmatpush3.bf16.msra.mxu1 %v1141_v25 }
 0x162   : > { %1049 = vmatprep.subr.bf16.mxu0 %v1288_v9  ;;  %1057 = vmatprep.subr.bf16.mxu1 %v1288_v9 }
 0x164   : > { %1038 = vmatmul.mubr.msk.bf16.vlgmr.msra.gmra.mrb[4].mxu0 %vm352_vm0, %v381_v23  ;;  %1046 = vmatmul.mubr.msk.bf16.vlgmr.msra.gmra.mrb[4].mxu1 %vm352_vm0, %v381_v23 }
 0x165   : > { %1050 = vmatpush3.bf16.msra.mxu0 %v1142_v26  ;;  %1058 = vmatpush3.bf16.msra.mxu1 %v1143_v27 }
 0x166   : > { %1051 = vmatprep.subr.bf16.mxu0 %v1288_v9  ;;  %1059 = vmatprep.subr.bf16.mxu1 %v1288_v9 }
 0x167   : > { %1053 = vmatprep.mubr.msk.bf16.mxu0 %vm1289_vm1, %v1288_v9  ;;  %1061 = vmatprep.mubr.msk.bf16.mxu1 %vm1289_vm1, %v1288_v9 }
 0x169   : > { %1052 = vmatpush3.bf16.msra.mxu0 %v1144_v28  ;;  %1060 = vmatpush3.bf16.msra.mxu1 %v1145_v29 }
 0x16c   : > { %1054 = vmatmul.mubr.msk.bf16.vlgmr.msra.gmra.mrb[8].mxu0 %vm352_vm0, %v381_v23  ;;  %1062 = vmatmul.mubr.msk.bf16.vlgmr.msra.gmra.mrb[8].mxu1 %vm352_vm0, %v381_v23 }
 0x22f   : > { %v435_v30 = vpop.f32.mrb[0].mxu0  ;;  %v495_v31 = vpop.f32.mrb[0].mxu1 }
 0x230   : > { %v441_v32 = vmul.f32 0.25, %v435_v30  ;;  %v501_v33 = vpack.c.bf16 %v495_v31, %v495_v31  ;;  %v1023_v34 = vpop.f32.mrb[1].mxu0  ;;  %v1031_v35 = vpop.f32.mrb[1].mxu1 }
 0x231   : > { %v438_v36 = vpop.f32.mrb[2].mxu0  ;;  %v498_v37 = vpop.f32.mrb[2].mxu1 }
 0x232   : > { %v442_v38 = vpack.c.bf16 %v441_v32, %v441_v32  ;;  %502 = vst.msk [vmem:[%s1463_s24] sm:$0xf] %vm443_vm2, %v501_v33  ;;  %v1024_v39 = vpop.f32.mrb[3].mxu0  ;;  %v1032_v40 = vpop.f32.mrb[3].mxu1 }
 0x234   : > { %444 = vst.msk [vmem:[%s326_s25] sm:$0xf] %vm443_vm2, %v442_v38 }
 0x237   : > { %v553_v41 = vpop.f32.mrb[4].mxu0  ;;  %v612_v42 = vpop.f32.mrb[4].mxu1 }
 0x238   : > { %v559_v43 = vpack.c.bf16 %v553_v41, %v553_v41  ;;  %v618_v44 = vmul.f32 0.25, %v612_v42  ;;  %v1039_v45 = vpop.f32.mrb[5].mxu0  ;;  %v1047_v46 = vpop.f32.mrb[5].mxu1 }
 0x239   : > { %v556_v47 = vpop.f32.mrb[6].mxu0  ;;  %v615_v48 = vpop.f32.mrb[6].mxu1 }
 0x23a   : > { %560 = vst.msk [vmem:[%s1473_s16] sm:$0xf] %vm443_vm2, %v559_v43  ;;  %v619_v49 = vpack.c.bf16 %v618_v44, %v618_v44  ;;  %v1040_v50 = vpop.f32.mrb[7].mxu0  ;;  %v1048_v51 = vpop.f32.mrb[7].mxu1 }
 0x23c   : > { %968 = vst.msk [vmem:[%s326_s25 + $0x4] sm:$0xf] %vm443_vm2, %v619_v49 }
 0x23d   : > { %1161 = shalt.err (!%p1158_p5)
}
 0x23e   : > { %s1162_s11 = scalar_lea.hbm %s1481_s20, 128  ;;  %s1166_s1 = scalar_lea.hbm %s1624_s6, 256 }
 0x23f   : > { %p1163_p6 = scmp.ne.s32.totalorder %s1481_s20, %s1162_s11  ;;  %p1167_p10 = scmp.lt.u32.totalorder %s1481_s20, %s1624_s6 }
 0x240   : > { %p1168_p11 = scmp.lt.u32.totalorder %s1166_s1, %s1162_s11  ;;  %p1170_p13 = scmp.lt.u32.totalorder %s1162_s11, %s1481_s20 }
 0x241   : > { %p1164_p7 = pnand %p1163_p6, %p1382_p4 }
 0x242   : > { %p1169_p12 = por %p1168_p11, %p1167_p10 }
 0x243   : > { %p1165_p9 = pneg %p1164_p7 }
 0x244   : > { %p1171_p0 = por %p1170_p13, %p1169_p12 }
 0x246   : > { %p1172_p1 = pnand %p1171_p0, %p1165_p9 }
 0x248   : > { %1175 = shalt.err (!%p1172_p1)
}
 0x249   : > { %s1628_s0 = smov 64   ;;  %s1292_s30 = smov 4   ;;  %v673_v52 = vpop.f32.mrb[8].mxu0  ;;  %v733_v53 = vpop.f32.mrb[8].mxu1 }
 0x24a   : > { %1065 = dma.vmem_to_hbm [thread:$0]  (%p1382_p4), %s1471_s26, 128, %s1481_s20, %s1491_s23, %s1628_s0, %s1628_s0, %s1292_s30   ;;  %v679_v54 = vpack.c.bf16 %v673_v52, %v673_v52  ;;  %v739_v55 = vpack.c.bf16 %v733_v53, %v733_v53  ;;  %v1055_v56 = vpop.f32.mrb[9].mxu0  ;;  %v1063_v57 = vpop.f32.mrb[9].mxu1 }
 0x24b   : > { %s801_s11 = sshll.u32 %s1473_s16, 4  ;;  %s1527_s1 = scalar_lea.hbm %s1625_s7, %s1469_s14  ;;  %v676_v58 = vpop.f32.mrb[10].mxu0  ;;  %v736_v59 = vpop.f32.mrb[10].mxu1  ;;  %s1529_s11 = int_to_ptr.vmem [resolvable:$true] %s801_s11 }
 0x24c   : > { %s1535_s23 = scalar_lea.hbm %s1626_s8, %s1469_s14  ;;  %976 = vst.msk [vmem:[%s1463_s24 + $0x4] sm:$0xf] %vm443_vm2, %v679_v54  ;;  %984 = vst.msk [vmem:[%s1473_s16 + $0x4] sm:$0xf] %vm443_vm2, %v739_v55  ;;  %v1056_v60 = vpop.f32.mrb[11].mxu0  ;;  %v1064_v61 = vpop.f32.mrb[11].mxu1 }
 0x24d   : > { %s748_s19 = scalar_lea.sflag [#allocation5], %s1487_s12  ;;  %s1176_s2 = scalar_lea.vmem %s1521_s21, 128 }
 0x24e   : > { %p1177_p2 = scmp.ne.s32.totalorder %s1521_s21, %s1176_s2  ;;  %s1293_s22 = smov [#allocation4]  }
 0x24f   : > { %s1180_s25 = sshll.u32 %s1293_s22, 4  ;;  %s1181_s25 = int_to_ptr.vmem [resolvable:$false] %s1180_s25 }
 0x250   : > { %p1178_p3 = pnand %p1177_p2, %p1382_p4  ;;  %s1182_s0 = scalar_lea.vmem %s1181_s25, 256 }
 0x251   : > { %p1183_p6 = scmp.lt.s32.totalorder %s1521_s21, %s1181_s25  ;;  %p1184_p7 = scmp.lt.s32.totalorder %s1182_s0, %s1176_s2 }
 0x252   : > { %p1179_p5 = pneg %p1178_p3 }
 0x253   : > { %p1185_p9 = por %p1184_p7, %p1183_p6 }
 0x255   : > { %p1186_p10 = pnand %p1185_p9, %p1179_p5 }
 0x257   : > { %1189 = shalt.err (!%p1186_p10)
}
 0x258   : > { %s1190_s24 = scalar_lea.hbm %s1527_s1, 128  ;;  %s1194_s26 = scalar_lea.hbm %s1625_s7, 256 }
 0x259   : > { %p1191_p11 = scmp.ne.s32.totalorder %s1527_s1, %s1190_s24  ;;  %p1195_p0 = scmp.lt.u32.totalorder %s1527_s1, %s1625_s7 }
 0x25a   : > { %p1196_p1 = scmp.lt.u32.totalorder %s1194_s26, %s1190_s24  ;;  %p1198_p3 = scmp.lt.u32.totalorder %s1190_s24, %s1527_s1 }
 0x25b   : > { %p1192_p12 = pnand %p1191_p11, %p1382_p4 }
 0x25c   : > { %p1197_p2 = por %p1196_p1, %p1195_p0 }
 0x25d   : > { %p1193_p13 = pneg %p1192_p12 }
 0x25e   : > { %p1199_p5 = por %p1198_p3, %p1197_p2 }
 0x260   : > { %p1200_p6 = pnand %p1199_p5, %p1193_p13 }
 0x262   : > { %1203 = shalt.err (!%p1200_p6)
}
 0x263   : > { %s1638_s0 = smov 64   ;;  %s1204_s2 = scalar_lea.vmem %s1529_s11, 128 }
 0x264   : > { %1066 = dma.vmem_to_hbm [thread:$0]  (%p1382_p4), %s1521_s21, 128, %s1527_s1, %s748_s19, %s1638_s0, %s1638_s0, %s1292_s30  }
 0x265   : > { %p1205_p7 = scmp.ne.s32.totalorder %s1529_s11, %s1204_s2  ;;  %s1294_s25 = smov [#allocation6]  }
 0x266   : > { %s1208_s24 = sshll.u32 %s1294_s25, 4  ;;  %s1209_s24 = int_to_ptr.vmem [resolvable:$false] %s1208_s24 }
 0x267   : > { %p1206_p9 = pnand %p1205_p7, %p1382_p4  ;;  %s1210_s14 = scalar_lea.vmem %s1209_s24, 256 }
 0x268   : > { %p1211_p11 = scmp.lt.s32.totalorder %s1529_s11, %s1209_s24  ;;  %p1212_p12 = scmp.lt.s32.totalorder %s1210_s14, %s1204_s2 }
 0x269   : > { %p1207_p10 = pneg %p1206_p9 }
 0x26a   : > { %p1213_p13 = por %p1212_p12, %p1211_p11 }
 0x26c   : > { %p1214_p0 = pnand %p1213_p13, %p1207_p10 }
 0x26e   : > { %1217 = shalt.err (!%p1214_p0)
}
 0x26f   : > { %s1218_s21 = scalar_lea.hbm %s1535_s23, 128  ;;  %s1222_s26 = scalar_lea.hbm %s1626_s8, 256 }
 0x270   : > { %p1219_p1 = scmp.ne.s32.totalorder %s1535_s23, %s1218_s21  ;;  %p1223_p5 = scmp.lt.u32.totalorder %s1535_s23, %s1626_s8 }
 0x271   : > { %p1224_p6 = scmp.lt.u32.totalorder %s1222_s26, %s1218_s21  ;;  %p1226_p9 = scmp.lt.u32.totalorder %s1218_s21, %s1535_s23 }
 0x272   : > { %p1220_p2 = pnand %p1219_p1, %p1382_p4 }
 0x273   : > { %p1225_p7 = por %p1224_p6, %p1223_p5 }
 0x274   : > { %p1221_p3 = pneg %p1220_p2 }
 0x275   : > { %p1227_p10 = por %p1226_p9, %p1225_p7 }
 0x277   : > { %p1228_p11 = pnand %p1227_p10, %p1221_p3 }
 0x279   : > { %1231 = shalt.err (!%p1228_p11)
}
 0x27a   : > { %1067 = dma.vmem_to_hbm [thread:$0]  (%p1382_p4), %s1529_s11, 128, %s1535_s23, %s748_s19, %s1638_s0, %s1638_s0, %s1292_s30  }
 0x27b PF: > { %p1081_p12 = scmp.ge.s32.totalorder %s1286_s10, 2  ;;  %s816_s2 = sand.u32 1, %s1266_s27  }
 0x27c   : > { %s817_s25 = scalar_lea.sflag [#allocation3], %s816_s2 }
 0x27d   : > { %p1072_p13 = pnand %p1081_p12, %p1391_p8 }
 0x27f   : > { %1257 = dma.done.wait (!%p1072_p13), %s817_s25, 128  }
 0x280   : > { %1259 = vsyncadd (!%p1072_p13), %s817_s25, 4294967168  ;;  %s1639_s15 = sadd.s32 4294967294, %s1286_s10  }
 0x281   : > { %s825_s24 = sand.u32 1, %s1639_s15  }
 0x282   : > { %s826_s14 = scalar_lea.sflag [#allocation5], %s825_s24 }
 0x283   : > { %1261 = dma.done.wait (!%p1072_p13), %s826_s14, 256  }
 0x284   : > { %1263 = vsyncadd (!%p1072_p13), %s826_s14, 4294967040  ;;  %s25_s10 = sadd.s32 1, %s1286_s10   ;;  %s1640_s27 = smov %s1270_s28 }
 0x285   : > { %p22_p4 = scmp.ge.s32.totalorder %s25_s10, 4   ;;  %s1641_s28 = smov %s1274_s29 }
 0x286   : > { %s1642_s29 = smov %s1397_s18  ;;  %s1643_s30 = smov %s1282_s9 }
 0x287   : > { %s1644_s9 = smov %s1646_s13  ;;  %24 = sbr.rel (!%p22_p4) target bundleno = 10 (0xa), region = 117 }
 0x28e   :  { %840 = vsyncpa [#allocation3], 1 }
 0x28f   :  { %842 = vsyncpa [#allocation3 + $0x1], 1 }
 0x290   :  { %843 = vsyncpa [#allocation5], 1 }
 0x291   :  { %845 = vsyncpa [#allocation5 + $0x1], 1 }

</bundles_post_ra>
